<compile_context>
chip_gen: v7x
topology: tpu7x:2x2x1
jax: 0.10.0
libtpu: 0.0.40
codegen_flags: <defaults>
</compile_context>

<pallas_src>
import functools

import jax
import jax.numpy as jnp
from jax import lax
from jax.experimental import pallas as pl
from jax.experimental.pallas import tpu as pltpu

LANES = 128
SUBLANES = 8


def _pinball_sum_kernel(pred_ref, y_ref, out_ref, acc_ref, *, tau, n_rows,
                        blocks_per_split, row_chunk, need_mask):
    p = pl.program_id(0)                  # TensorCore split ("parallel")
    j = pl.program_id(1)                  # row-block reduction ("arbitrary")
    row_block = pred_ref.shape[0]
    n_chunks = row_block // row_chunk     # static

    @pl.when(j == 0)
    def _():
        acc_ref[...] = jnp.zeros_like(acc_ref)

    # UNCLAMPED logical block index (the DMA index_map may clamp; the mask
    # must use the unclamped index so duplicated blocks contribute zero).
    blk = p * blocks_per_split + j

    def chunk_partial(c, masked):
        start = pl.multiple_of(c * row_chunk, row_chunk)
        pred = pred_ref[pl.ds(start, row_chunk), :].astype(jnp.float32)
        tgt = y_ref[pl.ds(start, row_chunk), :].astype(jnp.float32)
        delta = pred - tgt
        # max(tau*d, (tau-1)*d) == d * (tau if d >= 0 else tau-1): mul+select.
        loss = delta * jnp.where(delta >= 0, jnp.float32(tau),
                                 jnp.float32(tau - 1.0))
        if masked:
            # Rows past the logical end (partial boundary block, duplicated
            # clamped block, sublane-granule padding) contribute exactly zero.
            row_ids = (blk * row_block + start
                       + lax.broadcasted_iota(jnp.int32, (row_chunk, 1), 0))
            loss = jnp.where(row_ids < n_rows, loss, jnp.float32(0.0))
        # Sublane-group partial sums -> (8, 128); pure VPU vreg adds.
        return loss.reshape(-1, SUBLANES, LANES).sum(axis=0)

    def accumulate(masked):
        def body(c, acc):
            return acc + chunk_partial(c, masked)
        acc = lax.fori_loop(0, n_chunks, body,
                            jnp.zeros((SUBLANES, LANES), jnp.float32),
                            unroll=True)
        acc_ref[...] += acc

    if need_mask:
        # Only the block straddling n_rows (and clamped duplicates) pays the
        # mask cost; full interior blocks take the cheap path.
        block_is_full = (blk + 1) * row_block <= n_rows

        @pl.when(block_is_full)
        def _():
            accumulate(False)

        @pl.when(jnp.logical_not(block_is_full))
        def _():
            accumulate(True)
    else:
        accumulate(False)

    @pl.when(j == pl.num_programs(1) - 1)
    def _():
        # Single cross-lane/sublane reduce per split, once at the very end.
        out_ref[0, 0] = jnp.sum(acc_ref[...])


def _tpu_plan():
    """(per-input block bytes, #TensorCore splits) for the local TPU."""
    kind = ""
    try:
        kind = jax.devices()[0].device_kind.lower()
    except Exception:
        pass
    if "v7" in kind:
        # 2 TCs/chip, ~3.2 TB/s per TC: 4 MiB blocks amortize the ~0.35 us
        # per-step overhead; 4 MiB x 2 inputs x 2 buffers = 16 MiB VMEM.
        return 4 * 1024 * 1024, 2
    # v5e/v6e (single TC): 2 MiB x 2 x 2 = 8 MiB, inside v5e's 16 MiB default.
    return 2 * 1024 * 1024, 1


def pinball_loss(y_pred, y, tau):
    """Pallas implementation of PinballLoss(tau).forward(y_pred, y)."""
    assert y_pred.shape == y.shape, "y_pred and y must have the same shape"
    n = y_pred.size
    if n == 0:
        return jnp.float32(0.0)

    flat_p = jnp.ravel(y_pred)
    flat_y = jnp.ravel(y)

    n_rows = n // LANES
    n_main = n_rows * LANES

    # <128-element tail handled with plain jnp (no full-array pad copy).
    if n_main < n:
        dp = (flat_p[n_main:].astype(jnp.float32)
              - flat_y[n_main:].astype(jnp.float32))
        tail_sum = jnp.sum(jnp.maximum(tau * dp, (tau - 1.0) * dp))
    else:
        tail_sum = jnp.float32(0.0)

    if n_rows == 0:
        return tail_sum / jnp.float32(n)

    if n_main < n:
        # TODO(synk): this prefix slice may still materialize one copy per
        # input on the misaligned path; a manual-DMA (pl.ANY) variant could
        # stream the unsliced buffers directly.
        flat_p = flat_p[:n_main]
        flat_y = flat_y[:n_main]
    p2d = flat_p.reshape(n_rows, LANES)
    y2d = flat_y.reshape(n_rows, LANES)

    itemsize = jnp.dtype(y_pred.dtype).itemsize
    block_bytes, plan_splits = _tpu_plan()

    # Row granularity: 8 sublanes for 32-bit, 16 for 16-bit, 32 for 8-bit.
    row_gran = SUBLANES * max(1, 4 // itemsize)
    full_rows = ((n_rows + row_gran - 1) // row_gran) * row_gran

    # Compute chunk: ~512 KiB of f32 temporaries (1024 rows is a multiple of
    # every row_gran). DMA block: dtype-aware byte budget, a chunk multiple.
    if full_rows <= 1024:
        row_chunk = full_rows
        row_block = full_rows
    else:
        row_chunk = 1024
        row_block = max(row_chunk, block_bytes // (LANES * itemsize))
        row_block = (row_block // row_chunk) * row_chunk
        # Never ask for a block (and its DMA buffers) bigger than the array.
        row_block = min(row_block,
                        ((full_rows + row_chunk - 1) // row_chunk) * row_chunk)

    total_blocks = pl.cdiv(n_rows, row_block)
    num_splits = plan_splits if total_blocks >= plan_splits else 1
    blocks_per_split = pl.cdiv(total_blocks, num_splits)
    covered_rows = num_splits * blocks_per_split * row_block
    need_mask = covered_rows != n_rows
    last_block = total_blocks - 1
    needs_clamp = num_splits * blocks_per_split > total_blocks

    def in_index_map(p, j):
        blk = p * blocks_per_split + j
        if needs_clamp:
            blk = jnp.minimum(blk, last_block)   # never issue a fully-OOB DMA
        return (blk, 0)

    # TODO(synk): verify in an xprof trace that the leading "parallel" axis
    # actually shards across the two v7x TensorCores; if not, switch it to
    # pltpu.CORE_PARALLEL while keeping per-split scratch / output slots.
    partials = pl.pallas_call(
        functools.partial(
            _pinball_sum_kernel,
            tau=float(tau),
            n_rows=n_rows,
            blocks_per_split=blocks_per_split,
            row_chunk=row_chunk,
            need_mask=need_mask,
        ),
        out_shape=jax.ShapeDtypeStruct((num_splits, 1), jnp.float32),
        grid_spec=pltpu.PrefetchScalarGridSpec(
            num_scalar_prefetch=0,
            grid=(num_splits, blocks_per_split),
            in_specs=[
                pl.BlockSpec((row_block, LANES), in_index_map),
                pl.BlockSpec((row_block, LANES), in_index_map),
            ],
            out_specs=pl.BlockSpec(
                (1, 1), lambda p, j: (p, 0), memory_space=pltpu.SMEM
            ),
            scratch_shapes=[pltpu.VMEM((SUBLANES, LANES), jnp.float32)],
        ),
        compiler_params=pltpu.CompilerParams(
            dimension_semantics=("parallel", "arbitrary")
        ),
    )(p2d, y2d)

    return (jnp.sum(partials) + tail_sum) / jnp.float32(n)


def pinball_loss_ref(y_pred, y, tau):
    delta = y_pred.astype(jnp.float32) - y.astype(jnp.float32)
    return jnp.mean(jnp.maximum(tau * delta, (tau - 1.0) * delta))


if __name__ == "__main__":
    tau = 0.9  # quantile level (module "parameter")
    key = jax.random.PRNGKey(0)

    # Primary case: NCHW-style batch=2, channels=4, spatial=16x16 (aligned).
    k1, k2 = jax.random.split(key)
    y_pred = jax.random.normal(k1, (2, 4, 16, 16), dtype=jnp.float32)
    y = jax.random.normal(k2, (2, 4, 16, 16), dtype=jnp.float32)
    out = jax.block_until_ready(pinball_loss(y_pred, y, tau))
    ref = pinball_loss_ref(y_pred, y, tau)
    assert jnp.allclose(out, ref, rtol=1e-5, atol=1e-6), (out, ref)

    # Boundary-mask path: row count not a multiple of the sublane granule.
    k3, k4 = jax.random.split(k2)
    a = jax.random.normal(k3, (2, 4, 16, 17), dtype=jnp.float32)
    b = jax.random.normal(k4, (2, 4, 16, 17), dtype=jnp.float32)
    out2 = jax.block_until_ready(pinball_loss(a, b, tau))
    ref2 = pinball_loss_ref(a, b, tau)
    assert jnp.allclose(out2, ref2, rtol=1e-5, atol=1e-6), (out2, ref2)

    # Misaligned-tail path (<128-element remainder handled in plain jnp).
    k5, k6 = jax.random.split(k4)
    c = jax.random.normal(k5, (5, 411), dtype=jnp.float32)
    d = jax.random.normal(k6, (5, 411), dtype=jnp.float32)
    out3 = jax.block_until_ready(pinball_loss(c, d, tau))
    ref3 = pinball_loss_ref(c, d, tau)
    assert jnp.allclose(out3, ref3, rtol=1e-5, atol=1e-6), (out3, ref3)

    print("KERNEL_OK")
</pallas_src>

<mosaic_0001>
module attributes {stable_mosaic.version = 11 : i64} {
  func.func @_pinball_sum_kernel(%arg0: i32, %arg1: i32, %arg2: memref<16x128xf32, #tpu.memory_space<vmem>>, %arg3: memref<16x128xf32, #tpu.memory_space<vmem>>, %arg4: memref<1x1xf32, #tpu.memory_space<smem>>, %arg5: memref<8x128xf32, #tpu.memory_space<vmem>>) attributes {dimension_semantics = [#tpu.dimension_semantics<parallel>, #tpu.dimension_semantics<arbitrary>], iteration_bounds = array<i64: 1, 1>, scalar_prefetch = 0 : i64, scratch_operands = 1 : i64, tpu.core_type = #tpu.core_type<tc>, window_params = [{transform_indices = @transform_0, window_bounds = array<i64: 16, 128>}, {transform_indices = @transform_1, window_bounds = array<i64: 16, 128>}, {transform_indices = @transform_2, window_bounds = array<i64: 1, 1>}]} {
    %c0_i32 = arith.constant 0 : i32
    %0 = arith.cmpi eq, %arg1, %c0_i32 : i32
    %1 = arith.extui %0 : i1 to i32
    %c0_i32_0 = arith.constant 0 : i32
    %2 = arith.cmpi ne, %1, %c0_i32_0 : i32
    scf.if %2 {
      %cst_13 = arith.constant 0.000000e+00 : f32
      %26 = vector.broadcast %cst_13 : f32 to vector<8x128xf32>
      %c0_14 = arith.constant 0 : index
      %c0_15 = arith.constant 0 : index
      %27 = vector.load %arg5[%c0_14, %c0_15] : memref<8x128xf32, #tpu.memory_space<vmem>>, vector<8x128xf32>
      tpu.vector_store %arg5[%c0_14, %c0_15], %26 {strides = array<i32>} : memref<8x128xf32, #tpu.memory_space<vmem>>, vector<8x128xf32>,
    } else {
    }
    %cst = arith.constant 0.000000e+00 : f32
    %3 = vector.broadcast %cst : f32 to vector<8x128xf32>
    %c0_i32_1 = arith.constant 0 : i32
    %c16_i32 = arith.constant 16 : i32
    %4 = arith.muli %c0_i32_1, %c16_i32 : i32
    %5 = tpu.assume_multiple %4, 16 : i32
    %6 = arith.index_cast %5 : i32 to index
    %c0 = arith.constant 0 : index
    %7 = vector.load %arg2[%6, %c0] : memref<16x128xf32, #tpu.memory_space<vmem>>, vector<16x128xf32>
    %8 = arith.index_cast %5 : i32 to index
    %c0_2 = arith.constant 0 : index
    %9 = vector.load %arg3[%8, %c0_2] : memref<16x128xf32, #tpu.memory_space<vmem>>, vector<16x128xf32>
    %10 = arith.subf %7, %9 : vector<16x128xf32>
    %cst_3 = arith.constant 0.000000e+00 : f32
    %11 = vector.broadcast %cst_3 : f32 to vector<16x128xf32>
    %12 = arith.cmpf oge, %10, %11 : vector<16x128xf32>
    %cst_4 = arith.constant 0.899999976 : f32
    %cst_5 = arith.constant -1.000000e-01 : f32
    %13 = vector.broadcast %cst_4 : f32 to vector<16x128xf32>
    %14 = vector.broadcast %cst_5 : f32 to vector<16x128xf32>
    %15 = arith.select %12, %13, %14 : vector<16x128xi1>, vector<16x128xf32>
    %16 = arith.mulf %10, %15 : vector<16x128xf32>
    %17 = vector.shape_cast %16 : vector<16x128xf32> to vector<2x8x128xf32>
    %cst_6 = arith.constant dense<0.000000e+00> : vector<8x128xf32>
    %18 = vector.multi_reduction <add>, %17, %cst_6 [0] : vector<2x8x128xf32> to vector<8x128xf32>
    %19 = arith.addf %3, %18 : vector<8x128xf32>
    %c1_i32 = arith.constant 1 : i32
    %c0_7 = arith.constant 0 : index
    %c0_8 = arith.constant 0 : index
    %20 = vector.load %arg5[%c0_7, %c0_8] : memref<8x128xf32, #tpu.memory_space<vmem>>, vector<8x128xf32>
    %21 = arith.addf %20, %19 : vector<8x128xf32>
    %c0_9 = arith.constant 0 : index
    %c0_10 = arith.constant 0 : index
    %22 = vector.load %arg5[%c0_9, %c0_10] : memref<8x128xf32, #tpu.memory_space<vmem>>, vector<8x128xf32>
    tpu.vector_store %arg5[%c0_9, %c0_10], %21 {strides = array<i32>} : memref<8x128xf32, #tpu.memory_space<vmem>>, vector<8x128xf32>,
    %c0_i32_11 = arith.constant 0 : i32
    %23 = arith.cmpi eq, %arg1, %c0_i32_11 : i32
    %24 = arith.extui %23 : i1 to i32
    %c0_i32_12 = arith.constant 0 : i32
    %25 = arith.cmpi ne, %24, %c0_i32_12 : i32
    scf.if %25 {
      %c0_13 = arith.constant 0 : index
      %c0_14 = arith.constant 0 : index
      %26 = vector.load %arg5[%c0_13, %c0_14] : memref<8x128xf32, #tpu.memory_space<vmem>>, vector<8x128xf32>
      %27 = vector.shape_cast %26 : vector<8x128xf32> to vector<1x8x128xf32>
      %cst_15 = arith.constant dense<0.000000e+00> : vector<1xf32>
      %28 = vector.multi_reduction <add>, %27, %cst_15 [1, 2] : vector<1x8x128xf32> to vector<1xf32>
      %29 = vector.shape_cast %28 : vector<1xf32> to vector<1x1x1xf32>
      %30 = vector.extract %29[0, 0, 0] : f32 from vector<1x1x1xf32>
      %c0_16 = arith.constant 0 : index
      %c0_17 = arith.constant 0 : index
      %31 = memref.load %arg4[%c0_16, %c0_17] : memref<1x1xf32, #tpu.memory_space<smem>>
      memref.store %30, %arg4[%c0_16, %c0_17] : memref<1x1xf32, #tpu.memory_space<smem>>
    } else {
    }
    return
  }
  func.func @transform_0(%arg0: i32, %arg1: i32) -> (i32, i32) {
    %c1_i32 = arith.constant 1 : i32
    %0 = arith.muli %arg0, %c1_i32 : i32
    %1 = arith.addi %0, %arg1 : i32
    %c0_i32 = arith.constant 0 : i32
    %c0_i32_0 = arith.constant 0 : i32
    return %1, %c0_i32 : i32, i32
  }
  func.func @transform_1(%arg0: i32, %arg1: i32) -> (i32, i32) {
    %c1_i32 = arith.constant 1 : i32
    %0 = arith.muli %arg0, %c1_i32 : i32
    %1 = arith.addi %0, %arg1 : i32
    %c0_i32 = arith.constant 0 : i32
    %c0_i32_0 = arith.constant 0 : i32
    return %1, %c0_i32 : i32, i32
  }
  func.func @transform_2(%arg0: i32, %arg1: i32) -> (i32, i32) {
    %c0_i32 = arith.constant 0 : i32
    %c0_i32_0 = arith.constant 0 : i32
    return %arg0, %c0_i32 : i32, i32
  }
}

</mosaic_0001>

<bundles_post_ra>
// kernel: tpu_custom_call.1
= control target key start
LH: loop header
LB: loop body
LE: loop exit
PB: predicated region body
PF: predicated region fallthrough
CT: control target
= control target key end

     0   :  { %7 = vsyncpa [#allocation4], 0  ;;  %s229_s0 = inlined_call_operand.hbm [shape: f32[16,128], index: 0, kind: input, shape index: {}]   ;;  %s230_s1 = inlined_call_operand.hbm [shape: f32[16,128], index: 1, kind: input, shape index: {}]   ;;  %s231_s2 = inlined_call_operand.hbm [shape: f32[1,1], index: 2, kind: output, shape index: {}]  }
   0x1   :  { %8 = vsyncpa [#allocation7], 0 }
   0x2   :  { %9 = vsyncpa [#allocation5], 0  ;;  %s172_s9 = smov [#allocation3]   ;;  %s112_s13 = scalar_lea.hbm %s229_s0, 256 }
   0x3   :  { %s19_s10 = sshll.u32 %s172_s9, 4  ;;  %p113_p0 = scmp.ne.s32.totalorder %s229_s0, %s112_s13  ;;  %s20_s10 = int_to_ptr.vmem [resolvable:$true] %s19_s10 }
   0x4   :  { %p116_p1 = scmp.lt.u32.totalorder %s112_s13, %s229_s0 }
   0x6   :  { %p118_p2 = pnand %p116_p1, %p113_p0 }
   0x8   :  { %121 = shalt.err (!%p118_p2)
}
   0x9   :  { %s122_s18 = scalar_lea.vmem %s20_s10, 256  ;;  %p127_p4 = scmp.lt.s32.totalorder %s20_s10, %s20_s10 }
   0xa   :  { %p123_p3 = scmp.ne.s32.totalorder %s20_s10, %s122_s18  ;;  %p128_p5 = scmp.lt.s32.totalorder %s122_s18, %s122_s18 }
   0xc   :  { %p129_p6 = por %p128_p5, %p127_p4 }
   0xe   :  { %p130_p7 = pnand %p129_p6, %p123_p3 }
  0x10   :  { %133 = shalt.err (!%p130_p7)
}
  0x11   :  { %s173_s19 = smov 128   ;;  %s174_s20 = smov 8  }
  0x12   :  { %25 = dma.hbm_to_vmem [thread:$0]  %s229_s0, 256, %s20_s10, [#allocation4], %s173_s19, %s173_s19, %s174_s20  }
  0x13   :  { %s175_s23 = smov [#allocation6]   ;;  %s134_s27 = scalar_lea.hbm %s230_s1, 256 }
  0x14   :  { %s35_s24 = sshll.u32 %s175_s23, 4  ;;  %p135_p8 = scmp.ne.s32.totalorder %s230_s1, %s134_s27  ;;  %s36_s24 = int_to_ptr.vmem [resolvable:$true] %s35_s24 }
  0x15   :  { %p138_p9 = scmp.lt.u32.totalorder %s134_s27, %s230_s1 }
  0x17   :  { %p140_p10 = pnand %p138_p9, %p135_p8 }
  0x19   :  { %143 = shalt.err (!%p140_p10)
}
  0x1a   :  { %s144_s4 = scalar_lea.vmem %s36_s24, 256  ;;  %p149_p12 = scmp.lt.s32.totalorder %s36_s24, %s36_s24 }
  0x1b   :  { %p145_p11 = scmp.ne.s32.totalorder %s36_s24, %s144_s4  ;;  %p150_p13 = scmp.lt.s32.totalorder %s144_s4, %s144_s4 }
  0x1d   :  { %p151_p0 = por %p150_p13, %p149_p12 }
  0x1f   :  { %p152_p1 = pnand %p151_p0, %p145_p11 }
  0x21   :  { %155 = shalt.err (!%p152_p1)
}
  0x22   :  { %41 = dma.hbm_to_vmem [thread:$0]  %s230_s1, 256, %s36_s24, [#allocation7], %s173_s19, %s173_s19, %s174_s20  }
  0x23   :  { %166 = dma.done.wait [#allocation4], 256  }
  0x24   :  { %167 = vsyncadd [#allocation4], 4294967040 }
  0x25   :  { %168 = dma.done.wait [#allocation7], 256  }
  0x26   :  { %169 = vsyncadd [#allocation7], 4294967040  ;;  %v57_v0 = vld [vmem:[#allocation3] sm:$0xff]  ;;  %v58_v1 = vld [vmem:[#allocation3 + $0x8] sm:$0xff]  ;;  %v176_v6 = vmov -0.1  }
  0x27   :  { %v59_v2 = vld [vmem:[#allocation6] sm:$0xff]  ;;  %v60_v3 = vld [vmem:[#allocation6 + $0x8] sm:$0xff]  ;;  %s156_s8 = scalar_lea.hbm %s231_s2, 16 }
  0x28   :  { %v61_v4 = vsub.f32 %v57_v0, %v59_v2  ;;  %v62_v5 = vsub.f32 %v58_v1, %v60_v3  ;;  %p157_p2 = scmp.ne.s32.totalorder %s231_s2, %s156_s8  ;;  %p160_p3 = scmp.lt.u32.totalorder %s156_s8, %s231_s2 }
  0x2a   :  { %vm63_vm0 = vcmp.ge.f32.partialorder %v61_v4, 0.0  ;;  %vm64_vm1 = vcmp.ge.f32.partialorder %v62_v5, 0.0  ;;  %p162_p4 = pnand %p160_p3, %p157_p2 }
  0x2b   :  { %v65_v7 = vsel %vm63_vm0, 0.9, %v176_v6  ;;  %v66_v8 = vsel %vm64_vm1, 0.9, %v176_v6 }
  0x2c   :  { %v67_v9 = vmul.f32 %v65_v7, %v61_v4  ;;  %v68_v10 = vmul.f32 %v66_v8, %v62_v5 }
  0x2e   :  { %v69_v11 = vadd.f32 %v68_v10, %v67_v9 }
  0x30   :  { %78 = vadd.xlane.f32.xlu0 %v69_v11 }
  0xbd   :  { %v79_v12 = vpop.xlane.xlu0 %78 }
  0xbe   :  { %v80_v13 = vrot.slane %v79_v12, 4 }
  0xc0   :  { %v81_v14 = vadd.f32 %v80_v13, %v79_v12 }
  0xc2   :  { %v82_v15 = vrot.slane %v81_v14, 2 }
  0xc4   :  { %v83_v16 = vadd.f32 %v82_v15, %v81_v14 }
  0xc6   :  { %v84_v17 = vrot.slane %v83_v16, 1 }
  0xc8   :  { %v85_v18 = vadd.f32 %v84_v17, %v83_v16 }
  0xca   :  { %104 = vpush %v85_v18 }
  0xfb   :  { %s105_s1 = spop %104 }
  0xfc   :  { %88 = sst [smem:[#allocation8]] %s105_s1 }
  0xfd   :  { %165 = shalt.err (!%p162_p4)
}
  0xfe   :  { %s177_s13 = smov [#allocation8]  }
  0xff   :  { %96 = dma.smem_to_hbm %s177_s13, 16, %s231_s2, [#allocation5]  }
 0x100   :  { %170 = dma.done.wait [#allocation5], 16  }
 0x101   :  { %171 = vsyncadd [#allocation5], 4294967280 }
 0x102   :  { %100 = sfence }
 0x103   :  { %101 = vsyncpa [#allocation4], 1 }
 0x104   :  { %102 = vsyncpa [#allocation7], 1 }
 0x105   :  { %103 = vsyncpa [#allocation5], 1 }

</bundles_post_ra>
